<compile_context>
chip_gen: v5e
topology: v5e:2x2
jax: 0.10.0
libtpu: 0.0.40
codegen_flags: <defaults>
</compile_context>

<pallas_src>
import math

import jax
import jax.numpy as jnp
from jax import lax
from jax.experimental import pallas as pl
from jax.experimental.pallas import tpu as pltpu


# ----------------------------- Pallas kernel -----------------------------
def make_lstm_kernel(T, B, E, H, NCP):
    """Fused kernel for fixed (static) shapes.

    Inputs (all VMEM-resident, weights pre-fused to bf16 in the wrapper):
      x_ref   : (T*B, 2E+1) bf16  time-major [emb1_t | emb2_t | 1]
      wih_ref : (2E+1, 8H)  bf16  block-diag input weights + bias row,
                                  gate cols [i1,i2,f1,f2,o1,o2,g1,g2]
      whh_ref : (2H, 8H)    bf16  block-diag recurrent weights, same ordering
      wdb_ref : (2H+B, H)   bf16  dense weights for [h1,h2] stacked on top of
                                  the per-sample dense bias (one-hot folded in)
      wo_ref  : (H, NCP)    bf16  output weights, lane-padded to NCP
      out_ref : (B, NCP)    f32   lane-dense logits (wrapper adds bo, slices NC)
    """
    H2 = 2 * H
    bf16 = jnp.bfloat16

    def kernel(x_ref, wih_ref, whh_ref, wdb_ref, wo_ref, out_ref):
        # One big input projection for all T steps of both LSTMs at once
        # (off the serial critical path); bias comes from the ones column.
        xproj = jnp.dot(x_ref[...], wih_ref[...],
                        preferred_element_type=jnp.float32)       # (T*B, 8H) f32

        whh = whh_ref[...]                                        # (2H, 8H) bf16

        # Hoist the per-step row slices off the serial chain (loop-invariant).
        xs = [xproj[t * B:(t + 1) * B, :] for t in range(T)]

        # TODO(synk): ideally W_hh would be staged once in the MXU across all
        # unrolled steps (pltpu.matmul_push_rhs / matmul_acc_lhs); we rely on
        # Mosaic keeping the stationary RHS resident instead, for portability.

        def nonlin(gates):
            # sigmoid over the full (B, 4*H2) block (vreg-aligned), then slice;
            # only the last H2 lanes need tanh.
            sig = jax.nn.sigmoid(gates)
            i = sig[:, 0 * H2:1 * H2]
            f = sig[:, 1 * H2:2 * H2]
            o = sig[:, 2 * H2:3 * H2]
            g = jnp.tanh(gates[:, 3 * H2:4 * H2])
            return i, f, o, g

        # Step 0: h = c = 0 -> skip the recurrent matmul and the f*c term.
        i, _, o, g = nonlin(xs[0])
        c = i * g
        h = o * jnp.tanh(c)

        # Fully unrolled fused recurrence (T is small and static).
        for t in range(1, T):
            gates = xs[t] + jnp.dot(h.astype(bf16), whh,
                                    preferred_element_type=jnp.float32)  # (B, 8H)
            i, f, o, g = nonlin(gates)
            c = f * c + i * g
            h = o * jnp.tanh(c)

        # dense(concat(onehot, h1, h2)) == h_cat @ wd + (wd_oh[w] + bd)
        wd = wdb_ref[pl.ds(0, H2), :]                              # (2H, H) bf16
        bd = wdb_ref[pl.ds(H2, B), :].astype(jnp.float32)          # (B, H)
        feat = jnp.dot(h.astype(bf16), wd,
                       preferred_element_type=jnp.float32) + bd
        hidden = jnp.maximum(feat, 0.0)                            # ReLU (f32)
        out_ref[...] = jnp.dot(hidden.astype(bf16), wo_ref[...],
                               preferred_element_type=jnp.float32)

    return kernel


# ------------------------- weight fusion (wrapper) ------------------------
# Reference gate order along the 4H axis is [i, f, g, o]; we emit [i, f, o, g]
# per stream, interleaved -> [i1,i2,f1,f2,o1,o2,g1,g2].
_GATE_ORDER = (0, 1, 3, 2)


def _interleave_gates(m1, m2, H):
    parts = []
    for k in _GATE_ORDER:
        parts.append(m1[..., k * H:(k + 1) * H])
        parts.append(m2[..., k * H:(k + 1) * H])
    return jnp.concatenate(parts, axis=-1)


def fuse_params(params, E, H, NC, NCP):
    f32 = jnp.float32
    zE = jnp.zeros((E, 4 * H), f32)
    zH = jnp.zeros((H, 4 * H), f32)
    # Block-diagonal over the two streams, gate columns interleaved.
    wih_f = _interleave_gates(
        jnp.concatenate([params["wih1"], zE], axis=0),
        jnp.concatenate([zE, params["wih2"]], axis=0), H)          # (2E, 8H)
    whh_f = _interleave_gates(
        jnp.concatenate([params["whh1"], zH], axis=0),
        jnp.concatenate([zH, params["whh2"]], axis=0), H)          # (2H, 8H)
    b_f = _interleave_gates(params["b1"], params["b2"], H)         # (1, 8H)
    # Fold the bias into W_ih as an extra row (x gets a ones column).
    wih_aug = jnp.concatenate([wih_f, b_f], axis=0)                # (2E+1, 8H)
    wd_f = jnp.concatenate([params["wd_h1"], params["wd_h2"]], axis=0)  # (2H, H)
    # Lane-dense output weights: pad NC -> NCP with zero columns.
    wo_pad = jnp.zeros((H, NCP), f32).at[:, :NC].set(params["wo"])
    bf16 = jnp.bfloat16
    return (wih_aug.astype(bf16), whh_f.astype(bf16),
            wd_f.astype(bf16), wo_pad.astype(bf16))


def lstm_pallas_forward(emb_cat_tm, bd_eff, params):
    """emb_cat_tm: (T, B, 2E) time-major [emb1 | emb2]; bd_eff: (B, H)."""
    T, B, E2 = emb_cat_tm.shape
    E = E2 // 2
    H = params["whh1"].shape[0]
    NC = params["wo"].shape[1]
    NCP = 128                                                      # lane-dense out

    wih_aug, whh_f, wd_f, wo_pad = fuse_params(params, E, H, NC, NCP)

    x = emb_cat_tm.reshape(T * B, E2)                              # row t*B+b = (t, b)
    x_aug = jnp.concatenate(
        [x, jnp.ones((T * B, 1), x.dtype)], axis=1).astype(jnp.bfloat16)  # (T*B, 2E+1)
    # Pack dense weights and the (row-gathered) dense bias into one buffer.
    wdb = jnp.concatenate([wd_f, bd_eff.astype(jnp.bfloat16)], axis=0)    # (2H+B, H)

    kernel = make_lstm_kernel(T, B, E, H, NCP)
    vmem = pl.BlockSpec(memory_space=pltpu.MemorySpace.VMEM)
    args = (x_aug, wih_aug, whh_f, wdb, wo_pad)

    out = pl.pallas_call(
        kernel,
        out_shape=jax.ShapeDtypeStruct((B, NCP), jnp.float32),
        in_specs=[vmem] * len(args),
        out_specs=vmem,
    )(*args)
    # Output bias added here (one less tiny kernel operand); slice lane-pad.
    return out[:, :NC] + params["bo"]


def model_forward(X, w, emb_table, params, padding_size):
    """Mirrors LSTM.forward(X, w) from the PyTorch module."""
    emb = emb_table[X]                                             # (B, S, E)
    emb1 = emb[:, :padding_size + 1, :]                            # (B, T, E)
    emb2 = jnp.flip(emb[:, padding_size:, :], axis=(1, 2))         # (B, T, E)
    # TODO(synk): `.to('cuda')` in the reference is a device move; no-op here.

    emb_cat = jnp.concatenate([emb1, emb2], axis=-1)               # (B, T, 2E)
    emb_cat_tm = jnp.transpose(emb_cat, (1, 0, 2))                 # (T, B, 2E)

    # one_hot(w) @ wd_oh is just a row gather; fold it into the dense bias.
    bd_eff = params["wd_oh"][w] + params["bd"]                     # (B, H)

    logits = lstm_pallas_forward(emb_cat_tm, bd_eff, params)
    # torch.squeeze(dim=1) only squeezes if that dim has size 1.
    if logits.shape[1] == 1:
        logits = jnp.squeeze(logits, axis=1)
    return logits


# ---------------- pure-JAX reference (for sanity check) ----------------
def _ref_lstm(emb, wih, whh, b, H):
    B = emb.shape[0]

    def step(carry, x_t):
        h, c = carry
        gates = x_t @ wih + h @ whh + b[0]
        i = jax.nn.sigmoid(gates[:, :H])
        f = jax.nn.sigmoid(gates[:, H:2 * H])
        g = jnp.tanh(gates[:, 2 * H:3 * H])
        o = jax.nn.sigmoid(gates[:, 3 * H:])
        c = f * c + i * g
        h = o * jnp.tanh(c)
        return (h, c), None

    init = (jnp.zeros((B, H), jnp.float32), jnp.zeros((B, H), jnp.float32))
    (h, _), _ = lax.scan(step, init, jnp.transpose(emb, (1, 0, 2)))
    return h


def reference_forward(X, w, emb_table, params, padding_size):
    H = params["whh1"].shape[0]
    emb = emb_table[X]
    emb1 = emb[:, :padding_size + 1, :]
    emb2 = jnp.flip(emb[:, padding_size:, :], axis=(1, 2))
    h1 = _ref_lstm(emb1, params["wih1"], params["whh1"], params["b1"], H)
    h2 = _ref_lstm(emb2, params["wih2"], params["whh2"], params["b2"], H)
    onehot = jax.nn.one_hot(w, 30, dtype=jnp.float32)
    feat = (onehot @ params["wd_oh"] + h1 @ params["wd_h1"]
            + h2 @ params["wd_h2"] + params["bd"][0])
    hidden = jnp.maximum(feat, 0.0)
    logits = hidden @ params["wo"] + params["bo"][0]
    if logits.shape[1] == 1:
        logits = jnp.squeeze(logits, axis=1)
    return logits


if __name__ == "__main__":
    # Module hyperparameters (small, consistent with the forward pass).
    vocab_size = 50
    padding_size = 7
    embedding_dim = 16
    n_hidden_units = 32
    n_layers = 1          # h is squeezed on dim 0, so num_layers must be 1
    n_classes = 2
    n_words = 30          # must be 30 (F.one_hot(..., num_classes=30))

    B = 2
    S = 2 * padding_size + 1   # total sequence length = 15
    E, H, NW, NC = embedding_dim, n_hidden_units, n_words, n_classes

    key = jax.random.PRNGKey(0)
    keys = jax.random.split(key, 16)

    def u(k, shape, scale):
        return jax.random.uniform(k, shape, jnp.float32, -scale, scale)

    # Embedding table, padding_idx=0 row zeroed (nn.Embedding(padding_idx=0)).
    emb_table = u(keys[0], (vocab_size + 1, E), 0.5).at[0].set(0.0)

    sh = 1.0 / math.sqrt(H)
    sd = 1.0 / math.sqrt(NW + 2 * H)
    params = {
        # lstm1 / lstm2: weights (in, 4H), bias = b_ih + b_hh combined, (1, 4H)
        "wih1": u(keys[1], (E, 4 * H), sh),
        "whh1": u(keys[2], (H, 4 * H), sh),
        "b1":   u(keys[3], (1, 4 * H), sh),
        "wih2": u(keys[4], (E, 4 * H), sh),
        "whh2": u(keys[5], (H, 4 * H), sh),
        "b2":   u(keys[6], (1, 4 * H), sh),
        # dense: Linear(NW + 2H, H), weight pre-split in concat order
        # (onehot, h1, h2) to avoid in-kernel concatenation.
        "wd_oh": u(keys[7], (NW, H), sd),
        "wd_h1": u(keys[8], (H, H), sd),
        "wd_h2": u(keys[9], (H, H), sd),
        "bd":    u(keys[10], (1, H), sd),
        # out: Linear(H, NC)
        "wo": u(keys[11], (H, NC), sh),
        "bo": u(keys[12], (1, NC), sh),
    }

    X = jax.random.randint(keys[13], (B, S), 0, vocab_size + 1, dtype=jnp.int32)
    w = jax.random.randint(keys[14], (B,), 0, NW, dtype=jnp.int32)

    out = jax.block_until_ready(model_forward(X, w, emb_table, params, padding_size))
    ref = jax.block_until_ready(reference_forward(X, w, emb_table, params, padding_size))

    assert out.shape == (B, NC), out.shape
    assert bool(jnp.all(jnp.isfinite(out)))
    # bf16 MXU operands + f32 accumulate -> slightly looser tolerance than f32.
    assert bool(jnp.allclose(out, ref, atol=3e-2, rtol=3e-2)), (out, ref)
    print("KERNEL_OK")
</pallas_src>

<mosaic_0001>
module attributes {stable_mosaic.version = 11 : i64} {
  func.func @kernel(%arg0: memref<16x33xbf16, #tpu.memory_space<vmem>>, %arg1: memref<33x256xbf16, #tpu.memory_space<vmem>>, %arg2: memref<64x256xbf16, #tpu.memory_space<vmem>>, %arg3: memref<66x32xbf16, #tpu.memory_space<vmem>>, %arg4: memref<32x128xbf16, #tpu.memory_space<vmem>>, %arg5: memref<2x128xf32, #tpu.memory_space<vmem>>) attributes {dimension_semantics = [], scalar_prefetch = 0 : i64, scratch_operands = 0 : i64, tpu.core_type = #tpu.core_type<tc>} {
    %c0 = arith.constant 0 : index
    %c0_0 = arith.constant 0 : index
    %0 = vector.load %arg0[%c0, %c0_0] : memref<16x33xbf16, #tpu.memory_space<vmem>>, vector<16x33xbf16>
    %c0_1 = arith.constant 0 : index
    %c0_2 = arith.constant 0 : index
    %1 = vector.load %arg1[%c0_1, %c0_2] : memref<33x256xbf16, #tpu.memory_space<vmem>>, vector<33x256xbf16>
    %cst = arith.constant dense<0.000000e+00> : vector<16x256xf32>
    %2 = tpu.matmul %0, %1, %cst {dimension_numbers = #tpu.dot_dimension_numbers<[1], [0], [0], [1], [0, 0, 1, 1], [], []>} : vector<16x33xbf16>, vector<33x256xbf16>, vector<16x256xf32> -> vector<16x256xf32>
    %c0_3 = arith.constant 0 : index
    %c0_4 = arith.constant 0 : index
    %3 = vector.load %arg2[%c0_3, %c0_4] : memref<64x256xbf16, #tpu.memory_space<vmem>>, vector<64x256xbf16>
    %4 = vector.extract_strided_slice %2 {offsets = [0, 0], sizes = [2, 256], strides = [1, 1]} : vector<16x256xf32> to vector<2x256xf32>
    %5 = vector.extract_strided_slice %2 {offsets = [2, 0], sizes = [2, 256], strides = [1, 1]} : vector<16x256xf32> to vector<2x256xf32>
    %6 = vector.extract_strided_slice %2 {offsets = [4, 0], sizes = [2, 256], strides = [1, 1]} : vector<16x256xf32> to vector<2x256xf32>
    %7 = vector.extract_strided_slice %2 {offsets = [6, 0], sizes = [2, 256], strides = [1, 1]} : vector<16x256xf32> to vector<2x256xf32>
    %8 = vector.extract_strided_slice %2 {offsets = [8, 0], sizes = [2, 256], strides = [1, 1]} : vector<16x256xf32> to vector<2x256xf32>
    %9 = vector.extract_strided_slice %2 {offsets = [10, 0], sizes = [2, 256], strides = [1, 1]} : vector<16x256xf32> to vector<2x256xf32>
    %10 = vector.extract_strided_slice %2 {offsets = [12, 0], sizes = [2, 256], strides = [1, 1]} : vector<16x256xf32> to vector<2x256xf32>
    %11 = vector.extract_strided_slice %2 {offsets = [14, 0], sizes = [2, 256], strides = [1, 1]} : vector<16x256xf32> to vector<2x256xf32>
    %12 = arith.negf %4 : vector<2x256xf32>
    %13 = math.exp %12 : vector<2x256xf32>
    %cst_5 = arith.constant 1.000000e+00 : f32
    %14 = vector.broadcast %cst_5 : f32 to vector<2x256xf32>
    %15 = arith.addf %14, %13 : vector<2x256xf32>
    %16 = arith.divf %14, %15 : vector<2x256xf32>
    %17 = vector.extract_strided_slice %16 {offsets = [0, 0], sizes = [2, 64], strides = [1, 1]} : vector<2x256xf32> to vector<2x64xf32>
    %18 = vector.extract_strided_slice %16 {offsets = [0, 128], sizes = [2, 64], strides = [1, 1]} : vector<2x256xf32> to vector<2x64xf32>
    %19 = vector.extract_strided_slice %4 {offsets = [0, 192], sizes = [2, 64], strides = [1, 1]} : vector<2x256xf32> to vector<2x64xf32>
    %20 = math.tanh %19 : vector<2x64xf32>
    %21 = arith.mulf %17, %20 : vector<2x64xf32>
    %22 = math.tanh %21 : vector<2x64xf32>
    %23 = arith.mulf %18, %22 : vector<2x64xf32>
    %24 = arith.truncf %23 : vector<2x64xf32> to vector<2x64xbf16>
    %cst_6 = arith.constant dense<0.000000e+00> : vector<2x256xf32>
    %25 = tpu.matmul %24, %3, %cst_6 {dimension_numbers = #tpu.dot_dimension_numbers<[1], [0], [0], [1], [0, 0, 1, 1], [], []>} : vector<2x64xbf16>, vector<64x256xbf16>, vector<2x256xf32> -> vector<2x256xf32>
    %26 = arith.addf %5, %25 : vector<2x256xf32>
    %27 = arith.negf %26 : vector<2x256xf32>
    %28 = math.exp %27 : vector<2x256xf32>
    %cst_7 = arith.constant 1.000000e+00 : f32
    %29 = vector.broadcast %cst_7 : f32 to vector<2x256xf32>
    %30 = arith.addf %29, %28 : vector<2x256xf32>
    %31 = arith.divf %29, %30 : vector<2x256xf32>
    %32 = vector.extract_strided_slice %31 {offsets = [0, 0], sizes = [2, 64], strides = [1, 1]} : vector<2x256xf32> to vector<2x64xf32>
    %33 = vector.extract_strided_slice %31 {offsets = [0, 64], sizes = [2, 64], strides = [1, 1]} : vector<2x256xf32> to vector<2x64xf32>
    %34 = vector.extract_strided_slice %31 {offsets = [0, 128], sizes = [2, 64], strides = [1, 1]} : vector<2x256xf32> to vector<2x64xf32>
    %35 = vector.extract_strided_slice %26 {offsets = [0, 192], sizes = [2, 64], strides = [1, 1]} : vector<2x256xf32> to vector<2x64xf32>
    %36 = math.tanh %35 : vector<2x64xf32>
    %37 = arith.mulf %33, %21 : vector<2x64xf32>
    %38 = arith.mulf %32, %36 : vector<2x64xf32>
    %39 = arith.addf %37, %38 : vector<2x64xf32>
    %40 = math.tanh %39 : vector<2x64xf32>
    %41 = arith.mulf %34, %40 : vector<2x64xf32>
    %42 = arith.truncf %41 : vector<2x64xf32> to vector<2x64xbf16>
    %cst_8 = arith.constant dense<0.000000e+00> : vector<2x256xf32>
    %43 = tpu.matmul %42, %3, %cst_8 {dimension_numbers = #tpu.dot_dimension_numbers<[1], [0], [0], [1], [0, 0, 1, 1], [], []>} : vector<2x64xbf16>, vector<64x256xbf16>, vector<2x256xf32> -> vector<2x256xf32>
    %44 = arith.addf %6, %43 : vector<2x256xf32>
    %45 = arith.negf %44 : vector<2x256xf32>
    %46 = math.exp %45 : vector<2x256xf32>
    %cst_9 = arith.constant 1.000000e+00 : f32
    %47 = vector.broadcast %cst_9 : f32 to vector<2x256xf32>
    %48 = arith.addf %47, %46 : vector<2x256xf32>
    %49 = arith.divf %47, %48 : vector<2x256xf32>
    %50 = vector.extract_strided_slice %49 {offsets = [0, 0], sizes = [2, 64], strides = [1, 1]} : vector<2x256xf32> to vector<2x64xf32>
    %51 = vector.extract_strided_slice %49 {offsets = [0, 64], sizes = [2, 64], strides = [1, 1]} : vector<2x256xf32> to vector<2x64xf32>
    %52 = vector.extract_strided_slice %49 {offsets = [0, 128], sizes = [2, 64], strides = [1, 1]} : vector<2x256xf32> to vector<2x64xf32>
    %53 = vector.extract_strided_slice %44 {offsets = [0, 192], sizes = [2, 64], strides = [1, 1]} : vector<2x256xf32> to vector<2x64xf32>
    %54 = math.tanh %53 : vector<2x64xf32>
    %55 = arith.mulf %51, %39 : vector<2x64xf32>
    %56 = arith.mulf %50, %54 : vector<2x64xf32>
    %57 = arith.addf %55, %56 : vector<2x64xf32>
    %58 = math.tanh %57 : vector<2x64xf32>
    %59 = arith.mulf %52, %58 : vector<2x64xf32>
    %60 = arith.truncf %59 : vector<2x64xf32> to vector<2x64xbf16>
    %cst_10 = arith.constant dense<0.000000e+00> : vector<2x256xf32>
    %61 = tpu.matmul %60, %3, %cst_10 {dimension_numbers = #tpu.dot_dimension_numbers<[1], [0], [0], [1], [0, 0, 1, 1], [], []>} : vector<2x64xbf16>, vector<64x256xbf16>, vector<2x256xf32> -> vector<2x256xf32>
    %62 = arith.addf %7, %61 : vector<2x256xf32>
    %63 = arith.negf %62 : vector<2x256xf32>
    %64 = math.exp %63 : vector<2x256xf32>
    %cst_11 = arith.constant 1.000000e+00 : f32
    %65 = vector.broadcast %cst_11 : f32 to vector<2x256xf32>
    %66 = arith.addf %65, %64 : vector<2x256xf32>
    %67 = arith.divf %65, %66 : vector<2x256xf32>
    %68 = vector.extract_strided_slice %67 {offsets = [0, 0], sizes = [2, 64], strides = [1, 1]} : vector<2x256xf32> to vector<2x64xf32>
    %69 = vector.extract_strided_slice %67 {offsets = [0, 64], sizes = [2, 64], strides = [1, 1]} : vector<2x256xf32> to vector<2x64xf32>
    %70 = vector.extract_strided_slice %67 {offsets = [0, 128], sizes = [2, 64], strides = [1, 1]} : vector<2x256xf32> to vector<2x64xf32>
    %71 = vector.extract_strided_slice %62 {offsets = [0, 192], sizes = [2, 64], strides = [1, 1]} : vector<2x256xf32> to vector<2x64xf32>
    %72 = math.tanh %71 : vector<2x64xf32>
    %73 = arith.mulf %69, %57 : vector<2x64xf32>
    %74 = arith.mulf %68, %72 : vector<2x64xf32>
    %75 = arith.addf %73, %74 : vector<2x64xf32>
    %76 = math.tanh %75 : vector<2x64xf32>
    %77 = arith.mulf %70, %76 : vector<2x64xf32>
    %78 = arith.truncf %77 : vector<2x64xf32> to vector<2x64xbf16>
    %cst_12 = arith.constant dense<0.000000e+00> : vector<2x256xf32>
    %79 = tpu.matmul %78, %3, %cst_12 {dimension_numbers = #tpu.dot_dimension_numbers<[1], [0], [0], [1], [0, 0, 1, 1], [], []>} : vector<2x64xbf16>, vector<64x256xbf16>, vector<2x256xf32> -> vector<2x256xf32>
    %80 = arith.addf %8, %79 : vector<2x256xf32>
    %81 = arith.negf %80 : vector<2x256xf32>
    %82 = math.exp %81 : vector<2x256xf32>
    %cst_13 = arith.constant 1.000000e+00 : f32
    %83 = vector.broadcast %cst_13 : f32 to vector<2x256xf32>
    %84 = arith.addf %83, %82 : vector<2x256xf32>
    %85 = arith.divf %83, %84 : vector<2x256xf32>
    %86 = vector.extract_strided_slice %85 {offsets = [0, 0], sizes = [2, 64], strides = [1, 1]} : vector<2x256xf32> to vector<2x64xf32>
    %87 = vector.extract_strided_slice %85 {offsets = [0, 64], sizes = [2, 64], strides = [1, 1]} : vector<2x256xf32> to vector<2x64xf32>
    %88 = vector.extract_strided_slice %85 {offsets = [0, 128], sizes = [2, 64], strides = [1, 1]} : vector<2x256xf32> to vector<2x64xf32>
    %89 = vector.extract_strided_slice %80 {offsets = [0, 192], sizes = [2, 64], strides = [1, 1]} : vector<2x256xf32> to vector<2x64xf32>
    %90 = math.tanh %89 : vector<2x64xf32>
    %91 = arith.mulf %87, %75 : vector<2x64xf32>
    %92 = arith.mulf %86, %90 : vector<2x64xf32>
    %93 = arith.addf %91, %92 : vector<2x64xf32>
    %94 = math.tanh %93 : vector<2x64xf32>
    %95 = arith.mulf %88, %94 : vector<2x64xf32>
    %96 = arith.truncf %95 : vector<2x64xf32> to vector<2x64xbf16>
    %cst_14 = arith.constant dense<0.000000e+00> : vector<2x256xf32>
    %97 = tpu.matmul %96, %3, %cst_14 {dimension_numbers = #tpu.dot_dimension_numbers<[1], [0], [0], [1], [0, 0, 1, 1], [], []>} : vector<2x64xbf16>, vector<64x256xbf16>, vector<2x256xf32> -> vector<2x256xf32>
    %98 = arith.addf %9, %97 : vector<2x256xf32>
    %99 = arith.negf %98 : vector<2x256xf32>
    %100 = math.exp %99 : vector<2x256xf32>
    %cst_15 = arith.constant 1.000000e+00 : f32
    %101 = vector.broadcast %cst_15 : f32 to vector<2x256xf32>
    %102 = arith.addf %101, %100 : vector<2x256xf32>
    %103 = arith.divf %101, %102 : vector<2x256xf32>
    %104 = vector.extract_strided_slice %103 {offsets = [0, 0], sizes = [2, 64], strides = [1, 1]} : vector<2x256xf32> to vector<2x64xf32>
    %105 = vector.extract_strided_slice %103 {offsets = [0, 64], sizes = [2, 64], strides = [1, 1]} : vector<2x256xf32> to vector<2x64xf32>
    %106 = vector.extract_strided_slice %103 {offsets = [0, 128], sizes = [2, 64], strides = [1, 1]} : vector<2x256xf32> to vector<2x64xf32>
    %107 = vector.extract_strided_slice %98 {offsets = [0, 192], sizes = [2, 64], strides = [1, 1]} : vector<2x256xf32> to vector<2x64xf32>
    %108 = math.tanh %107 : vector<2x64xf32>
    %109 = arith.mulf %105, %93 : vector<2x64xf32>
    %110 = arith.mulf %104, %108 : vector<2x64xf32>
    %111 = arith.addf %109, %110 : vector<2x64xf32>
    %112 = math.tanh %111 : vector<2x64xf32>
    %113 = arith.mulf %106, %112 : vector<2x64xf32>
    %114 = arith.truncf %113 : vector<2x64xf32> to vector<2x64xbf16>
    %cst_16 = arith.constant dense<0.000000e+00> : vector<2x256xf32>
    %115 = tpu.matmul %114, %3, %cst_16 {dimension_numbers = #tpu.dot_dimension_numbers<[1], [0], [0], [1], [0, 0, 1, 1], [], []>} : vector<2x64xbf16>, vector<64x256xbf16>, vector<2x256xf32> -> vector<2x256xf32>
    %116 = arith.addf %10, %115 : vector<2x256xf32>
    %117 = arith.negf %116 : vector<2x256xf32>
    %118 = math.exp %117 : vector<2x256xf32>
    %cst_17 = arith.constant 1.000000e+00 : f32
    %119 = vector.broadcast %cst_17 : f32 to vector<2x256xf32>
    %120 = arith.addf %119, %118 : vector<2x256xf32>
    %121 = arith.divf %119, %120 : vector<2x256xf32>
    %122 = vector.extract_strided_slice %121 {offsets = [0, 0], sizes = [2, 64], strides = [1, 1]} : vector<2x256xf32> to vector<2x64xf32>
    %123 = vector.extract_strided_slice %121 {offsets = [0, 64], sizes = [2, 64], strides = [1, 1]} : vector<2x256xf32> to vector<2x64xf32>
    %124 = vector.extract_strided_slice %121 {offsets = [0, 128], sizes = [2, 64], strides = [1, 1]} : vector<2x256xf32> to vector<2x64xf32>
    %125 = vector.extract_strided_slice %116 {offsets = [0, 192], sizes = [2, 64], strides = [1, 1]} : vector<2x256xf32> to vector<2x64xf32>
    %126 = math.tanh %125 : vector<2x64xf32>
    %127 = arith.mulf %123, %111 : vector<2x64xf32>
    %128 = arith.mulf %122, %126 : vector<2x64xf32>
    %129 = arith.addf %127, %128 : vector<2x64xf32>
    %130 = math.tanh %129 : vector<2x64xf32>
    %131 = arith.mulf %124, %130 : vector<2x64xf32>
    %132 = arith.truncf %131 : vector<2x64xf32> to vector<2x64xbf16>
    %cst_18 = arith.constant dense<0.000000e+00> : vector<2x256xf32>
    %133 = tpu.matmul %132, %3, %cst_18 {dimension_numbers = #tpu.dot_dimension_numbers<[1], [0], [0], [1], [0, 0, 1, 1], [], []>} : vector<2x64xbf16>, vector<64x256xbf16>, vector<2x256xf32> -> vector<2x256xf32>
    %134 = arith.addf %11, %133 : vector<2x256xf32>
    %135 = arith.negf %134 : vector<2x256xf32>
    %136 = math.exp %135 : vector<2x256xf32>
    %cst_19 = arith.constant 1.000000e+00 : f32
    %137 = vector.broadcast %cst_19 : f32 to vector<2x256xf32>
    %138 = arith.addf %137, %136 : vector<2x256xf32>
    %139 = arith.divf %137, %138 : vector<2x256xf32>
    %140 = vector.extract_strided_slice %139 {offsets = [0, 0], sizes = [2, 64], strides = [1, 1]} : vector<2x256xf32> to vector<2x64xf32>
    %141 = vector.extract_strided_slice %139 {offsets = [0, 64], sizes = [2, 64], strides = [1, 1]} : vector<2x256xf32> to vector<2x64xf32>
    %142 = vector.extract_strided_slice %139 {offsets = [0, 128], sizes = [2, 64], strides = [1, 1]} : vector<2x256xf32> to vector<2x64xf32>
    %143 = vector.extract_strided_slice %134 {offsets = [0, 192], sizes = [2, 64], strides = [1, 1]} : vector<2x256xf32> to vector<2x64xf32>
    %144 = math.tanh %143 : vector<2x64xf32>
    %145 = arith.mulf %141, %129 : vector<2x64xf32>
    %146 = arith.mulf %140, %144 : vector<2x64xf32>
    %147 = arith.addf %145, %146 : vector<2x64xf32>
    %148 = math.tanh %147 : vector<2x64xf32>
    %149 = arith.mulf %142, %148 : vector<2x64xf32>
    %c0_20 = arith.constant 0 : index
    %c0_21 = arith.constant 0 : index
    %150 = vector.load %arg3[%c0_20, %c0_21] : memref<66x32xbf16, #tpu.memory_space<vmem>>, vector<64x32xbf16>
    %c64 = arith.constant 64 : index
    %c0_22 = arith.constant 0 : index
    %151 = vector.load %arg3[%c64, %c0_22] : memref<66x32xbf16, #tpu.memory_space<vmem>>, vector<2x32xbf16>
    %152 = arith.extf %151 : vector<2x32xbf16> to vector<2x32xf32>
    %153 = arith.truncf %149 : vector<2x64xf32> to vector<2x64xbf16>
    %cst_23 = arith.constant dense<0.000000e+00> : vector<2x32xf32>
    %154 = tpu.matmul %153, %150, %cst_23 {dimension_numbers = #tpu.dot_dimension_numbers<[1], [0], [0], [1], [0, 0, 1, 1], [], []>} : vector<2x64xbf16>, vector<64x32xbf16>, vector<2x32xf32> -> vector<2x32xf32>
    %155 = arith.addf %154, %152 : vector<2x32xf32>
    %cst_24 = arith.constant 0.000000e+00 : f32
    %156 = vector.broadcast %cst_24 : f32 to vector<2x32xf32>
    %157 = arith.maximumf %155, %156 : vector<2x32xf32>
    %158 = arith.truncf %157 : vector<2x32xf32> to vector<2x32xbf16>
    %c0_25 = arith.constant 0 : index
    %c0_26 = arith.constant 0 : index
    %159 = vector.load %arg4[%c0_25, %c0_26] : memref<32x128xbf16, #tpu.memory_space<vmem>>, vector<32x128xbf16>
    %cst_27 = arith.constant dense<0.000000e+00> : vector<2x128xf32>
    %160 = tpu.matmul %158, %159, %cst_27 {dimension_numbers = #tpu.dot_dimension_numbers<[1], [0], [0], [1], [0, 0, 1, 1], [], []>} : vector<2x32xbf16>, vector<32x128xbf16>, vector<2x128xf32> -> vector<2x128xf32>
    %c0_28 = arith.constant 0 : index
    %c0_29 = arith.constant 0 : index
    %161 = vector.load %arg5[%c0_28, %c0_29] : memref<2x128xf32, #tpu.memory_space<vmem>>, vector<2x128xf32>
    tpu.vector_store %arg5[%c0_28, %c0_29], %160 {strides = array<i32>} : memref<2x128xf32, #tpu.memory_space<vmem>>, vector<2x128xf32>,
    return
  }
}

</mosaic_0001>

<bundles_post_ra>
// kernel: tpu_custom_call.1
= control target key start
LH: loop header
LB: loop body
LE: loop exit
PB: predicated region body
PF: predicated region fallthrough
CT: control target
= control target key end

     0   :  { %10 = vsyncpa [#allocation3], 0  ;;  %s1586_s0 = inlined_call_operand.vmem [shape: bf16[16,33], index: 0, kind: input, shape index: {}]   ;;  %s1587_s1 = inlined_call_operand.vmem [shape: bf16[33,256], index: 1, kind: input, shape index: {}]   ;;  %s1588_s2 = inlined_call_operand.hbm [shape: bf16[64,256], index: 2, kind: input, shape index: {}]   ;;  %s1589_s3 = inlined_call_operand.vmem [shape: bf16[66,32], index: 3, kind: input, shape index: {}]   ;;  %s1590_s4 = inlined_call_operand.hbm [shape: bf16[32,128], index: 4, kind: input, shape index: {}]   ;;  %s1591_s5 = inlined_call_operand.hbm [shape: f32[2,128], index: 5, kind: output, shape index: {}]  }
   0x1   :  { %11 = vsyncpa [#allocation6], 0 }
   0x2   :  { %12 = vsyncpa [#allocation4], 0  ;;  %s21_s20 = sshll.u32 %s1588_s2, 4  ;;  %s1330_s21 = smov [#allocation2]   ;;  %s22_s20 = int_to_ptr.hbm [resolvable:$true] %s21_s20 }
   0x3   :  { %s23_s22 = sshll.u32 %s1330_s21, 4  ;;  %s36_s25 = sshll.u32 %s1590_s4, 4  ;;  %s24_s22 = int_to_ptr.vmem [resolvable:$true] %s23_s22  ;;  %s37_s25 = int_to_ptr.hbm [resolvable:$true] %s36_s25 }
   0x4   :  { %s1331_s26 = smov 128   ;;  %s1332_s27 = smov 8  }
   0x5   :  { %29 = dma.hbm_to_vmem [thread:$0]  %s22_s20, 1024, %s24_s22, [#allocation3], %s1331_s26, %s1331_s26, %s1332_s27  }
   0x6   :  { %s1333_s28 = smov [#allocation5]   ;;  %s1334_s30 = smov 64  }
   0x7   :  { %s38_s29 = sshll.u32 %s1333_s28, 4  ;;  %s1335_s6 = smov 4   ;;  %s39_s29 = int_to_ptr.vmem [resolvable:$true] %s38_s29 }
   0x8   :  { %44 = dma.hbm_to_vmem [thread:$0]  %s37_s25, 256, %s39_s29, [#allocation6], %s1334_s30, %s1334_s30, %s1335_s6  }
   0x9   :  { %1324 = dma.done.wait [#allocation3], 1024  }
   0xa   :  { %1325 = vsyncadd [#allocation3], 4294966272 }
   0xb   :  { %1326 = dma.done.wait [#allocation6], 256  }
   0xc   :  { %1327 = vsyncadd [#allocation6], 4294967040  ;;  %vm95_vm0 = vcmask 1040384   ;;  %v60_v0 = vld [vmem:[%s1587_s1 + $0x20] sm:$0x11]  ;;  %v1336_v3 = vmov 0  }
   0xd   :  { %v80_v1 = vunpack.c.h.b16 %v60_v0  ;;  %v79_v2 = vunpack.c.l.b16 %v60_v0  ;;  %v97_v4 = vsel %vm95_vm0, 65535, %v1336_v3  ;;  %v1132_v6 = vld [vmem:[%s1587_s1 + $0x14] sm:$0xf]  ;;  %v1035_v8 = vld [vmem:[%s1587_s1 + $0x18] sm:$0xf0]  ;;  %v1129_v21 = vld [vmem:[%s1586_s0] sm:$0xff] }
   0xe   :  { %v1033_v9 = vld [vmem:[%s1587_s1 + $0x10] sm:$0xf]  ;;  %v1133_v10 = vld [vmem:[%s1587_s1 + $0x14] sm:$0xf0]  ;;  %v1038_v13 = vor.u32 %v1132_v6, %v1035_v8  ;;  %v1130_v14 = vld [vmem:[%s1587_s1 + $0x4] sm:$0xf] }
   0xf   :  { %v86_v5 = vpack.c.b16 %v80_v1, %v80_v1  ;;  %v85_v7 = vpack.c.b16 %v79_v2, %v79_v2  ;;  %v1034_v15 = vor.u32 %v1133_v10, %v1033_v9  ;;  %v1027_v16 = vld [vmem:[%s1587_s1 + $0x8] sm:$0xf0]  ;;  %v1025_v17 = vld [vmem:[%s1587_s1] sm:$0xf]  ;;  %v1131_v18 = vld [vmem:[%s1587_s1 + $0x4] sm:$0xf0] }
  0x10   :  { %v1030_v19 = vor.u32 %v1130_v14, %v1027_v16  ;;  %v1026_v20 = vor.u32 %v1131_v18, %v1025_v17  ;;  %vm91_vm1 = vcmask 269312   ;;  %v1069_v22 = vld [vmem:[#allocation2 + $0x30] sm:$0xf]  ;;  %v1141_v23 = vld [vmem:[#allocation2 + $0x34] sm:$0xf0]  ;;  %vm227_vm10 = vcmask 523264  }
  0x11   :  { %v102_v11 = vand.u32 %v97_v4, %v86_v5  ;;  %v99_v12 = vand.u32 %v97_v4, %v85_v7  ;;  %v1140_v24 = vld [vmem:[#allocation2 + $0x34] sm:$0xf]  ;;  %v1406_v25 = vor.u32 %v1141_v23, %v1069_v22  ;;  %v1071_v26 = vld [vmem:[#allocation2 + $0x38] sm:$0xf0]  ;;  %v1061_v35 = vld [vmem:[#allocation2 + $0x20] sm:$0xf] }
  0x12   :  { %v1408_v27 = vor.u32 %v1140_v24, %v1071_v26  ;;  %v1139_v36 = vld [vmem:[#allocation2 + $0x24] sm:$0xf0]  ;;  %v1138_v37 = vld [vmem:[#allocation2 + $0x24] sm:$0xf]  ;;  %v1063_v39 = vld [vmem:[#allocation2 + $0x28] sm:$0xf0] }
  0x13   :  { %123 = vmatpush.bf16.msra.mxu1 %v102_v11  ;;  %109 = vmatpush.bf16.msra.mxu0 %v99_v12  ;;  %v1424_v38 = vor.u32 %v1139_v36, %v1061_v35  ;;  %v1426_v40 = vor.u32 %v1138_v37, %v1063_v39  ;;  %v1053_v41 = vld [vmem:[#allocation2 + $0x10] sm:$0xf]  ;;  %v1137_v42 = vld [vmem:[#allocation2 + $0x14] sm:$0xf0]  ;;  %v1136_v43 = vld [vmem:[#allocation2 + $0x14] sm:$0xf] }
  0x14   :  { %235 = vmatpush.bf16.msra.mxu2 %v1406_v25  ;;  %248 = vmatpush.bf16.msra.mxu3 %v1408_v27  ;;  %v1433_v44 = vor.u32 %v1137_v42, %v1053_v41  ;;  %v1055_v45 = vld [vmem:[#allocation2 + $0x18] sm:$0xf0]  ;;  %v1045_v46 = vld [vmem:[#allocation2] sm:$0xf]  ;;  %v1135_v47 = vld [vmem:[#allocation2 + $0x4] sm:$0xf0] }
  0x15   :  { %v1435_v49 = vor.u32 %v1136_v43, %v1055_v45  ;;  %v1134_v50 = vld [vmem:[#allocation2 + $0x4] sm:$0xf]  ;;  %v1047_v51 = vld [vmem:[#allocation2 + $0x8] sm:$0xf0]  ;;  %v1438_v52 = vor.u32 %v1135_v47, %v1045_v46  ;;  %s1337_s7 = smov [#allocation7]   ;;  %s1008_s10 = sshll.u32 %s1591_s5, 4  ;;  %s1009_s10 = int_to_ptr.hbm [resolvable:$true] %s1008_s10 }
  0x16   :  { %v1442_v53 = vor.u32 %v1134_v50, %v1047_v51  ;;  %s1006_s4 = sshll.u32 %s1337_s7, 4  ;;  %s1007_s4 = int_to_ptr.vmem [resolvable:$true] %s1006_s4 }
  0x17   :  { %124 = vmatpush.bf16.msra.mxu1 %v1038_v13  ;;  %110 = vmatpush.bf16.msra.mxu0 %v1034_v15 }
  0x18   :  { %236 = vmatpush.bf16.msra.mxu2 %v1424_v38  ;;  %249 = vmatpush.bf16.msra.mxu3 %v1426_v40 }
  0x1b   :  { %125 = vmatpush.bf16.msra.mxu1 %v1030_v19  ;;  %111 = vmatpush.bf16.msra.mxu0 %v1026_v20 }
  0x1c   :  { %237 = vmatpush.bf16.msra.mxu2 %v1433_v44  ;;  %250 = vmatpush.bf16.msra.mxu3 %v1435_v49 }
  0x1e   :  { %1040 = vmatmul.msk.bf16.vlgmr.msra.gmra.mxu1 %vm91_vm1, %v1129_v21  ;;  %1039 = vmatmul.msk.bf16.vlgmr.msra.gmra.mxu0 %vm91_vm1, %v1129_v21 }
  0x1f   :  { %336 = vmatpush.bf16.msrb.mxu0 %v1406_v25  ;;  %349 = vmatpush.bf16.msrb.mxu1 %v1408_v27 }
  0x20   :  { %238 = vmatpush.bf16.msra.mxu2 %v1438_v52  ;;  %251 = vmatpush.bf16.msra.mxu3 %v1442_v53 }
  0x23   :  { %337 = vmatpush.bf16.msrb.mxu0 %v1424_v38  ;;  %350 = vmatpush.bf16.msrb.mxu1 %v1426_v40 }
  0x24   :  { %448 = vmatpush.bf16.msrb.mxu3 %v1408_v27  ;;  %435 = vmatpush.bf16.msrb.mxu2 %v1406_v25 }
  0x27   :  { %338 = vmatpush.bf16.msrb.mxu0 %v1433_v44  ;;  %351 = vmatpush.bf16.msrb.mxu1 %v1435_v49 }
  0x28   :  { %449 = vmatpush.bf16.msrb.mxu3 %v1426_v40  ;;  %436 = vmatpush.bf16.msrb.mxu2 %v1424_v38 }
  0x2b   :  { %339 = vmatpush.bf16.msrb.mxu0 %v1438_v52  ;;  %352 = vmatpush.bf16.msrb.mxu1 %v1442_v53 }
  0x2c   :  { %450 = vmatpush.bf16.msrb.mxu3 %v1435_v49  ;;  %437 = vmatpush.bf16.msrb.mxu2 %v1433_v44 }
  0x2f   :  { %547 = vmatpush.bf16.msra.mxu1 %v1408_v27  ;;  %534 = vmatpush.bf16.msra.mxu0 %v1406_v25 }
  0x30   :  { %451 = vmatpush.bf16.msrb.mxu3 %v1442_v53  ;;  %438 = vmatpush.bf16.msrb.mxu2 %v1438_v52 }
  0x33   :  { %548 = vmatpush.bf16.msra.mxu1 %v1426_v40  ;;  %535 = vmatpush.bf16.msra.mxu0 %v1424_v38 }
  0x37   :  { %549 = vmatpush.bf16.msra.mxu1 %v1435_v49  ;;  %536 = vmatpush.bf16.msra.mxu0 %v1433_v44 }
  0x3b   :  { %550 = vmatpush.bf16.msra.mxu1 %v1442_v53  ;;  %537 = vmatpush.bf16.msra.mxu0 %v1438_v52 }
  0x9b   :  { %v1414_v28 = vpop.f32.mrf.mxu1  ;;  %v1418_v30 = vpop.f32.mrf.mxu0 }
  0x9c   :  { %1156 = vtanh.f32 %v1414_v28  ;;  %v1041_v31 = vmul.f32 -1.442695, %v1418_v30  ;;  %v1042_v33 = vmul.f32 -1.442695, %v1414_v28 }
  0x9e   :  { %1158 = vpow2.f32 %v1041_v31 }
  0x9f   :  { %1160 = vpow2.f32 %v1042_v33 }
  0xa2   :  { %v1157_v29 = vpop.eup %1156 }
  0xa3   :  { %180 = vrot.lane.b32.xlu0 %v1157_v29, %s1334_s30 }
  0xa4   :  { %v1159_v32 = vpop.eup %1158 }
  0xa5   :  { %v1422_v34 = vadd.f32 1.0, %v1159_v32  ;;  %v1161_v48 = vpop.eup %1160 }
  0xa6   :  { %v147_v54 = vadd.f32 1.0, %v1161_v48 }
  0xa7   :  { %1162 = vrcp.f32 %v1422_v34  ;;  %vm153_vm2 = vweird.f32 %v1422_v34  ;;  %v159_v61 = vand.u32 2147483648, %v1422_v34  ;;  %v157_v63 = vand.u32 2147483647, %v1422_v34 }
  0xa8   :  { %1164 = vrcp.f32 %v147_v54  ;;  %v174_v9 = vand.u32 2147483648, %v147_v54  ;;  %vm168_vm7 = vweird.f32 %v147_v54  ;;  %v172_v10 = vand.u32 2147483647, %v147_v54 }
  0xa9   :  { %v160_v1 = vor.u32 1.1754944e-38, %v159_v61  ;;  %vm158_vm5 = vcmp.eq.f32.partialorder %v157_v63, 8.507059e+37 }
  0xaa   :  { %v175_v12 = vor.u32 1.1754944e-38, %v174_v9  ;;  %vm173_vm9 = vcmp.eq.f32.partialorder %v172_v10, 8.507059e+37  ;;  %v1498_v9 = vpop.f32.mrf.mxu1  ;;  %v1500_v10 = vpop.f32.mrf.mxu0 }
  0xad   :  { %v1163_v55 = vpop.eup %1162 }
  0xae   :  { %v149_v56 = vmul.f32 %v1163_v55, %v1422_v34  ;;  %v1165_v58 = vpop.eup %1164  ;;  %vm154_vm3 = vweird.f32 %v1163_v55 }
  0xaf   :  { %v164_v60 = vmul.f32 %v1165_v58, %v147_v54  ;;  %vm155_vm4 = vmor %vm153_vm2, %vm154_vm3  ;;  %vm169_vm6 = vweird.f32 %v1165_v58 }
  0xb0   :  { %v150_v57 = vsub.f32 1.0, %v149_v56  ;;  %vm170_vm8 = vmor %vm168_vm7, %vm169_vm6 }
  0xb1   :  { %v165_v0 = vsub.f32 1.0, %v164_v60 }
  0xb2   :  { %v151_v59 = vmul.f32 %v1163_v55, %v150_v57 }
  0xb3   :  { %v166_v3 = vmul.f32 %v1165_v58, %v165_v0 }
  0xb4   :  { %v152_v62 = vadd.f32 %v1163_v55, %v151_v59 }
  0xb5   :  { %v167_v7 = vadd.f32 %v1165_v58, %v166_v3 }
  0xb6   :  { %v156_v2 = vsel %vm155_vm4, %v1163_v55, %v152_v62 }
  0xb7   :  { %v161_v5 = vsel %vm158_vm5, %v160_v1, %v156_v2  ;;  %v171_v11 = vsel %vm170_vm8, %v1165_v58, %v167_v7 }
  0xb8   :  { %v176_v14 = vsel %vm173_vm9, %v175_v12, %v171_v11 }
 0x115   :  { %v181_v4 = vpop.permute.xlu0 %180 }
 0x116   :  { %v183_v6 = vmul.f32 %v181_v4, %v161_v5 }
 0x118   :  { %1166 = vtanh.f32 %v183_v6  ;;  %v305_v8 = vrot.slane %v183_v6, 6 }
 0x11a   :  { %306 = vrot.lane.b32.xlu1 %v305_v8, %s1334_s30 }
 0x11e   :  { %v1167_v13 = vpop.eup %1166 }
 0x11f   :  { %v185_v15 = vmul.f32 %v1167_v13, %v176_v14 }
 0x121   :  { %v186_v16 = vpack.c.bf16 %v185_v15, %v185_v15 }
 0x123   :  { %1075 = vmatmul.msk.bf16.vlgmr.msra.gmra.mxu2 %vm227_vm10, %v186_v16  ;;  %1076 = vmatmul.msk.bf16.vlgmr.msra.gmra.mxu3 %vm227_vm10, %v186_v16 }
 0x124   :  { %638 = vmatpush.bf16.msra.mxu3 %v1408_v27  ;;  %625 = vmatpush.bf16.msra.mxu2 %v1406_v25 }
 0x128   :  { %639 = vmatpush.bf16.msra.mxu3 %v1426_v40  ;;  %626 = vmatpush.bf16.msra.mxu2 %v1424_v38 }
 0x12c   :  { %640 = vmatpush.bf16.msra.mxu3 %v1435_v49  ;;  %627 = vmatpush.bf16.msra.mxu2 %v1433_v44 }
 0x130   :  { %641 = vmatpush.bf16.msra.mxu3 %v1442_v53  ;;  %628 = vmatpush.bf16.msra.mxu2 %v1438_v52 }
 0x18c   :  { %v307_v48 = vpop.permute.xlu1 %306 }
 0x1a6   :  { %v240_v17 = vpop.f32.mrf.mxu2  ;;  %v253_v18 = vpop.f32.mrf.mxu3 }
 0x1a7   :  { %v260_v19 = vrot.slane %v253_v18, 6  ;;  %v259_v24 = vrot.slane %v240_v17, 6 }
 0x1a9   :  { %v264_v20 = vadd.f32 %v260_v19, %v1414_v28  ;;  %v263_v26 = vadd.f32 %v259_v24, %v1418_v30 }
 0x1ab   :  { %1168 = vtanh.f32 %v264_v20  ;;  %v1077_v29 = vmul.f32 -1.442695, %v263_v26  ;;  %v1078_v56 = vmul.f32 -1.442695, %v264_v20 }
 0x1ad   :  { %1170 = vpow2.f32 %v1077_v29 }
 0x1ae   :  { %v242_v21 = vpop.f32.mrf.mxu2  ;;  %v255_v22 = vpop.f32.mrf.mxu3 }
 0x1b1   :  { %v1169_v23 = vpop.eup %1168 }
 0x1b2   :  { %311 = vrot.lane.b32.xlu0 %v1169_v23, %s1334_s30 }
 0x1b3   :  { %v1171_v31 = vpop.eup %1170 }
 0x1b4   :  { %v271_v32 = vadd.f32 1.0, %v1171_v31 }
 0x1b6   :  { %1172 = vrcp.f32 %v271_v32  ;;  %v284_v39 = vand.u32 2147483648, %v271_v32  ;;  %vm278_vm12 = vweird.f32 %v271_v32  ;;  %v282_v41 = vand.u32 2147483647, %v271_v32 }
 0x1b8   :  { %v285_v43 = vor.u32 1.1754944e-38, %v284_v39  ;;  %vm283_vm14 = vcmp.eq.f32.partialorder %v282_v41, 8.507059e+37 }
 0x1bc   :  { %v1173_v33 = vpop.eup %1172 }
 0x1bd   :  { %v274_v34 = vmul.f32 %v1173_v33, %v271_v32  ;;  %vm279_vm11 = vweird.f32 %v1173_v33 }
 0x1be   :  { %vm280_vm13 = vmor %vm278_vm12, %vm279_vm11 }
 0x1bf   :  { %v275_v35 = vsub.f32 1.0, %v274_v34 }
 0x1c1   :  { %v276_v36 = vmul.f32 %v1173_v33, %v275_v35 }
 0x1c3   :  { %v277_v37 = vadd.f32 %v1173_v33, %v276_v36 }
 0x1c5   :  { %v281_v42 = vsel %vm280_vm13, %v1173_v33, %v277_v37 }
 0x1c6   :  { %v286_v46 = vsel %vm283_vm14, %v285_v43, %v281_v42 }
 0x1c7   :  { %v309_v50 = vmul.f32 %v307_v48, %v286_v46 }
 0x224   :  { %v312_v45 = vpop.permute.xlu0 %311 }
 0x225   :  { %v314_v47 = vmul.f32 %v312_v45, %v286_v46 }
 0x227   :  { %316 = vrot.lane.b32.xlu1 %v314_v47, %s1334_s30 }
 0x299   :  { %v317_v51 = vpop.permute.xlu1 %316 }
 0x29a   :  { %v1484_v54 = vadd.f32 %v317_v51, %v309_v50 }
 0x29c   :  { %1174 = vtanh.f32 %v1484_v54  ;;  %v406_v41 = vrot.slane %v1484_v54, 6 }
 0x29d   :  { %1176 = vpow2.f32 %v1078_v56 }
 0x2a2   :  { %v1175_v55 = vpop.eup %1174 }
 0x2a3   :  { %322 = vrot.lane.b32.xlu2 %v1175_v55, %s1334_s30  ;;  %v1177_v57 = vpop.eup %1176 }
 0x2a4   :  { %v272_v58 = vadd.f32 1.0, %v1177_v57 }
 0x2a6   :  { %1178 = vrcp.f32 %v272_v58  ;;  %v299_v0 = vand.u32 2147483648, %v272_v58  ;;  %vm293_vm0 = vweird.f32 %v272_v58  ;;  %v297_v1 = vand.u32 2147483647, %v272_v58 }
 0x2a8   :  { %v300_v3 = vor.u32 1.1754944e-38, %v299_v0  ;;  %vm298_vm2 = vcmp.eq.f32.partialorder %v297_v1, 8.507059e+37 }
 0x2ac   :  { %v1179_v59 = vpop.eup %1178 }
 0x2ad   :  { %v289_v60 = vmul.f32 %v1179_v59, %v272_v58  ;;  %vm294_vm15 = vweird.f32 %v1179_v59 }
 0x2ae   :  { %vm295_vm1 = vmor %vm293_vm0, %vm294_vm15 }
 0x2af   :  { %v290_v61 = vsub.f32 1.0, %v289_v60 }
 0x2b1   :  { %v291_v62 = vmul.f32 %v1179_v59, %v290_v61 }
 0x2b3   :  { %v292_v63 = vadd.f32 %v1179_v59, %v291_v62 }
 0x2b5   :  { %v296_v2 = vsel %vm295_vm1, %v1179_v59, %v292_v63 }
 0x2b6   :  { %v301_v4 = vsel %vm298_vm2, %v300_v3, %v296_v2 }
 0x2fd   :  { %v323_v5 = vpop.permute.xlu2 %322 }
 0x2fe   :  { %v325_v6 = vmul.f32 %v323_v5, %v301_v4 }
 0x300   :  { %v326_v7 = vpack.c.bf16 %v325_v6, %v325_v6 }
 0x302   :  { %v328_v8 = vrot.slane %v326_v7, 1 }
 0x304   :  { %1079 = vmatmul.msk.bf16.vlgmr.msrb.gmra.mxu0 %vm227_vm10, %v328_v8  ;;  %1080 = vmatmul.msk.bf16.vlgmr.msrb.gmra.mxu1 %vm227_vm10, %v328_v8 }
 0x305   :  { %737 = vmatpush.bf16.msrb.mxu1 %v1408_v27  ;;  %724 = vmatpush.bf16.msrb.mxu0 %v1406_v25 }
 0x309   :  { %738 = vmatpush.bf16.msrb.mxu1 %v1426_v40  ;;  %725 = vmatpush.bf16.msrb.mxu0 %v1424_v38 }
 0x30d   :  { %739 = vmatpush.bf16.msrb.mxu1 %v1435_v49  ;;  %726 = vmatpush.bf16.msrb.mxu0 %v1433_v44 }
 0x311   :  { %740 = vmatpush.bf16.msrb.mxu1 %v1442_v53  ;;  %727 = vmatpush.bf16.msrb.mxu0 %v1438_v52 }
 0x381   :  { %v341_v11 = vpop.f32.mrf.mxu0  ;;  %v354_v12 = vpop.f32.mrf.mxu1 }
 0x382   :  { %v361_v13 = vrot.slane %v354_v12, 4  ;;  %v360_v18 = vrot.slane %v341_v11, 4 }
 0x384   :  { %v365_v14 = vadd.f32 %v361_v13, %v1414_v28  ;;  %v364_v19 = vadd.f32 %v360_v18, %v1418_v30 }
 0x386   :  { %1180 = vtanh.f32 %v365_v14  ;;  %v1081_v20 = vmul.f32 -1.442695, %v364_v19  ;;  %v1082_v47 = vmul.f32 -1.442695, %v365_v14 }
 0x388   :  { %1182 = vpow2.f32 %v1081_v20 }
 0x389   :  { %v343_v15 = vpop.f32.mrf.mxu0  ;;  %v356_v16 = vpop.f32.mrf.mxu1 }
 0x38c   :  { %v1181_v17 = vpop.eup %1180 }
 0x38d   :  { %410 = vrot.lane.b32.xlu2 %v1181_v17, %s1334_s30 }
 0x38e   :  { %v1183_v21 = vpop.eup %1182 }
 0x38f   :  { %v372_v22 = vadd.f32 1.0, %v1183_v21 }
 0x391   :  { %1184 = vrcp.f32 %v372_v22  ;;  %v385_v32 = vand.u32 2147483648, %v372_v22  ;;  %vm379_vm4 = vweird.f32 %v372_v22  ;;  %v383_v33 = vand.u32 2147483647, %v372_v22 }
 0x393   :  { %v386_v35 = vor.u32 1.1754944e-38, %v385_v32  ;;  %vm384_vm6 = vcmp.eq.f32.partialorder %v383_v33, 8.507059e+37 }
 0x397   :  { %v1185_v23 = vpop.eup %1184 }
 0x398   :  { %v375_v24 = vmul.f32 %v1185_v23, %v372_v22  ;;  %vm380_vm3 = vweird.f32 %v1185_v23 }
 0x399   :  { %vm381_vm5 = vmor %vm379_vm4, %vm380_vm3 }
 0x39a   :  { %v376_v26 = vsub.f32 1.0, %v375_v24 }
 0x39c   :  { %v377_v29 = vmul.f32 %v1185_v23, %v376_v26 }
 0x39e   :  { %v378_v31 = vadd.f32 %v1185_v23, %v377_v29 }
 0x3a0   :  { %v382_v34 = vsel %vm381_vm5, %v1185_v23, %v378_v31 }
 0x3a1   :  { %v387_v37 = vsel %vm384_vm6, %v386_v35, %v382_v34 }
 0x3a2   :  { %v408_v42 = vmul.f32 %v406_v41, %v387_v37 }
 0x3e7   :  { %v411_v36 = vpop.permute.xlu2 %410 }
 0x3e8   :  { %v413_v39 = vmul.f32 %v411_v36, %v387_v37 }
 0x3ea   :  { %415 = vrot.lane.b32.xlu0 %v413_v39, %s1334_s30 }
 0x45c   :  { %v416_v43 = vpop.permute.xlu0 %415 }
 0x45d   :  { %v1507_v45 = vadd.f32 %v416_v43, %v408_v42 }
 0x45f   :  { %1186 = vtanh.f32 %v1507_v45  ;;  %v505_v19 = vrot.slane %v1507_v45, 6 }
 0x460   :  { %1188 = vpow2.f32 %v1082_v47 }
 0x465   :  { %v1187_v46 = vpop.eup %1186 }
 0x466   :  { %421 = vrot.lane.b32.xlu1 %v1187_v46, %s1334_s30  ;;  %v1189_v48 = vpop.eup %1188 }
 0x467   :  { %v373_v50 = vadd.f32 1.0, %v1189_v48 }
 0x469   :  { %1190 = vrcp.f32 %v373_v50  ;;  %v400_v54 = vand.u32 2147483648, %v373_v50  ;;  %vm394_vm8 = vweird.f32 %v373_v50  ;;  %v398_v59 = vand.u32 2147483647, %v373_v50 }
 0x46b   :  { %v401_v61 = vor.u32 1.1754944e-38, %v400_v54  ;;  %vm399_vm11 = vcmp.eq.f32.partialorder %v398_v59, 8.507059e+37 }
 0x46f   :  { %v1191_v51 = vpop.eup %1190 }
 0x470   :  { %v390_v55 = vmul.f32 %v1191_v51, %v373_v50  ;;  %vm395_vm7 = vweird.f32 %v1191_v51 }
 0x471   :  { %vm396_vm9 = vmor %vm394_vm8, %vm395_vm7 }
 0x472   :  { %v391_v56 = vsub.f32 1.0, %v390_v55 }
 0x474   :  { %v392_v57 = vmul.f32 %v1191_v51, %v391_v56 }
 0x476   :  { %v393_v58 = vadd.f32 %v1191_v51, %v392_v57 }
 0x478   :  { %v397_v60 = vsel %vm396_vm9, %v1191_v51, %v393_v58 }
 0x479   :  { %v402_v62 = vsel %vm399_vm11, %v401_v61, %v397_v60 }
 0x4d8   :  { %v422_v63 = vpop.permute.xlu1 %421 }
 0x4d9   :  { %v424_v0 = vmul.f32 %v422_v63, %v402_v62 }
 0x4db   :  { %v425_v1 = vpack.c.bf16 %v424_v0, %v424_v0 }
 0x4dd   :  { %v427_v2 = vrot.slane %v425_v1, 2 }
 0x4df   :  { %1083 = vmatmul.msk.bf16.vlgmr.msrb.gmra.mxu2 %vm227_vm10, %v427_v2  ;;  %1084 = vmatmul.msk.bf16.vlgmr.msrb.gmra.mxu3 %vm227_vm10, %v427_v2 }
 0x4e0   :  { %836 = vmatpush.bf16.msrb.mxu3 %v1408_v27  ;;  %823 = vmatpush.bf16.msrb.mxu2 %v1406_v25 }
 0x4e4   :  { %837 = vmatpush.bf16.msrb.mxu3 %v1426_v40  ;;  %824 = vmatpush.bf16.msrb.mxu2 %v1424_v38 }
 0x4e8   :  { %838 = vmatpush.bf16.msrb.mxu3 %v1435_v49  ;;  %825 = vmatpush.bf16.msrb.mxu2 %v1433_v44 }
 0x4ec   :  { %839 = vmatpush.bf16.msrb.mxu3 %v1442_v53  ;;  %826 = vmatpush.bf16.msrb.mxu2 %v1438_v52 }
 0x562   :  { %v440_v3 = vpop.f32.mrf.mxu2  ;;  %v453_v4 = vpop.f32.mrf.mxu3 }
 0x563   :  { %v460_v5 = vrot.slane %v453_v4, 2  ;;  %v459_v38 = vrot.slane %v440_v3, 2 }
 0x565   :  { %v464_v6 = vadd.f32 %v460_v5, %v1414_v28  ;;  %v463_v40 = vadd.f32 %v459_v38, %v1418_v30 }
 0x567   :  { %1192 = vtanh.f32 %v464_v6  ;;  %v1085_v49 = vmul.f32 -1.442695, %v463_v40  ;;  %v1086_v24 = vmul.f32 -1.442695, %v464_v6 }
 0x569   :  { %1194 = vpow2.f32 %v1085_v49 }
 0x56a   :  { %v442_v27 = vpop.f32.mrf.mxu2  ;;  %v455_v25 = vpop.f32.mrf.mxu3 }
 0x56d   :  { %v1193_v7 = vpop.eup %1192 }
 0x56e   :  { %509 = vrot.lane.b32.xlu2 %v1193_v7, %s1334_s30 }
 0x56f   :  { %v1195_v44 = vpop.eup %1194 }
 0x570   :  { %v471_v53 = vadd.f32 1.0, %v1195_v44 }
 0x572   :  { %1196 = vrcp.f32 %v471_v53  ;;  %v484_v28 = vand.u32 2147483648, %v471_v53  ;;  %vm478_vm13 = vweird.f32 %v471_v53  ;;  %v482_v14 = vand.u32 2147483647, %v471_v53 }
 0x574   :  { %v485_v16 = vor.u32 1.1754944e-38, %v484_v28  ;;  %vm483_vm15 = vcmp.eq.f32.partialorder %v482_v14, 8.507059e+37 }
 0x578   :  { %v1197_v52 = vpop.eup %1196 }
 0x579   :  { %v474_v8 = vmul.f32 %v1197_v52, %v471_v53  ;;  %vm479_vm12 = vweird.f32 %v1197_v52 }
 0x57a   :  { %vm480_vm14 = vmor %vm478_vm13, %vm479_vm12 }
 0x57b   :  { %v475_v11 = vsub.f32 1.0, %v474_v8 }
 0x57d   :  { %v476_v12 = vmul.f32 %v1197_v52, %v475_v11 }
 0x57f   :  { %v477_v13 = vadd.f32 %v1197_v52, %v476_v12 }
 0x581   :  { %v481_v15 = vsel %vm480_vm14, %v1197_v52, %v477_v13 }
 0x582   :  { %v486_v30 = vsel %vm483_vm15, %v485_v16, %v481_v15 }
 0x583   :  { %v507_v20 = vmul.f32 %v505_v19, %v486_v30 }
 0x5c8   :  { %v510_v17 = vpop.permute.xlu2 %509 }
 0x5c9   :  { %v512_v18 = vmul.f32 %v510_v17, %v486_v30 }
 0x5cb   :  { %514 = vrot.lane.b32.xlu0 %v512_v18, %s1334_s30 }
 0x63d   :  { %v515_v21 = vpop.permute.xlu0 %514 }
 0x63e   :  { %v517_v22 = vadd.f32 %v515_v21, %v507_v20 }
 0x640   :  { %1198 = vtanh.f32 %v517_v22  ;;  %v598_v7 = vrot.slane %v517_v22, 6 }
 0x641   :  { %1200 = vpow2.f32 %v1086_v24 }
 0x646   :  { %v1199_v23 = vpop.eup %1198 }
 0x647   :  { %520 = vrot.lane.b32.xlu1 %v1199_v23, %s1334_s30  ;;  %v1201_v26 = vpop.eup %1200 }
 0x648   :  { %v472_v29 = vadd.f32 1.0, %v1201_v26 }
 0x64a   :  { %1202 = vrcp.f32 %v472_v29  ;;  %v499_v36 = vand.u32 2147483648, %v472_v29  ;;  %vm493_vm1 = vweird.f32 %v472_v29  ;;  %v497_v37 = vand.u32 2147483647, %v472_v29 }
 0x64c   :  { %v500_v41 = vor.u32 1.1754944e-38, %v499_v36  ;;  %vm498_vm3 = vcmp.eq.f32.partialorder %v497_v37, 8.507059e+37 }
 0x650   :  { %v1203_v31 = vpop.eup %1202 }
 0x651   :  { %v489_v32 = vmul.f32 %v1203_v31, %v472_v29  ;;  %vm494_vm0 = vweird.f32 %v1203_v31 }
 0x652   :  { %vm495_vm2 = vmor %vm493_vm1, %vm494_vm0 }
 0x653   :  { %v490_v33 = vsub.f32 1.0, %v489_v32 }
 0x655   :  { %v491_v34 = vmul.f32 %v1203_v31, %v490_v33 }
 0x657   :  { %v492_v35 = vadd.f32 %v1203_v31, %v491_v34 }
 0x659   :  { %v496_v39 = vsel %vm495_vm2, %v1203_v31, %v492_v35 }
 0x65a   :  { %v501_v42 = vsel %vm498_vm3, %v500_v41, %v496_v39 }
 0x6b9   :  { %v521_v43 = vpop.permute.xlu1 %520 }
 0x6ba   :  { %v523_v45 = vmul.f32 %v521_v43, %v501_v42 }
 0x6bc   :  { %v524_v46 = vpack.c.bf16 %v523_v45, %v523_v45 }
 0x6be   :  { %v526_v47 = vrot.slane %v524_v46, 3 }
 0x6c0   :  { %1087 = vmatmul.msk.bf16.vlgmr.msra.gmra.mxu0 %vm227_vm10, %v526_v47  ;;  %1088 = vmatmul.msk.bf16.vlgmr.msra.gmra.mxu1 %vm227_vm10, %v526_v47 }
 0x73d   :  { %v539_v48 = vpop.f32.mrf.mxu0  ;;  %v552_v50 = vpop.f32.mrf.mxu1 }
 0x73e   :  { %v557_v51 = vadd.f32 %v552_v50, %v1498_v9  ;;  %v556_v58 = vadd.f32 %v539_v48, %v1500_v10 }
 0x740   :  { %1204 = vtanh.f32 %v557_v51  ;;  %v1089_v54 = vmul.f32 -1.442695, %v556_v58  ;;  %v1090_v53 = vmul.f32 -1.442695, %v557_v51 }
 0x742   :  { %1206 = vpow2.f32 %v1089_v54 }
 0x745   :  { %v541_v55 = vpop.f32.mrf.mxu0  ;;  %v554_v56 = vpop.f32.mrf.mxu1 }
 0x746   :  { %v1205_v57 = vpop.eup %1204 }
 0x747   :  { %602 = vrot.lane.b32.xlu2 %v1205_v57, %s1334_s30 }
 0x748   :  { %v1207_v59 = vpop.eup %1206 }
 0x749   :  { %v564_v60 = vadd.f32 1.0, %v1207_v59 }
 0x74b   :  { %1208 = vrcp.f32 %v564_v60  ;;  %v577_v2 = vand.u32 2147483648, %v564_v60  ;;  %vm571_vm5 = vweird.f32 %v564_v60  ;;  %v575_v3 = vand.u32 2147483647, %v564_v60 }
 0x74d   :  { %v578_v5 = vor.u32 1.1754944e-38, %v577_v2  ;;  %vm576_vm7 = vcmp.eq.f32.partialorder %v575_v3, 8.507059e+37 }
 0x751   :  { %v1209_v61 = vpop.eup %1208 }
 0x752   :  { %v567_v62 = vmul.f32 %v1209_v61, %v564_v60  ;;  %vm572_vm4 = vweird.f32 %v1209_v61 }
 0x753   :  { %vm573_vm6 = vmor %vm571_vm5, %vm572_vm4 }
 0x754   :  { %v568_v63 = vsub.f32 1.0, %v567_v62 }
 0x756   :  { %v569_v0 = vmul.f32 %v1209_v61, %v568_v63 }
 0x758   :  { %v570_v1 = vadd.f32 %v1209_v61, %v569_v0 }
 0x75a   :  { %v574_v4 = vsel %vm573_vm6, %v1209_v61, %v570_v1 }
 0x75b   :  { %v579_v27 = vsel %vm576_vm7, %v578_v5, %v574_v4 }
 0x75c   :  { %v600_v38 = vmul.f32 %v598_v7, %v579_v27 }
 0x7a1   :  { %v603_v6 = vpop.permute.xlu2 %602 }
 0x7a2   :  { %v605_v25 = vmul.f32 %v603_v6, %v579_v27 }
 0x7a4   :  { %607 = vrot.lane.b32.xlu0 %v605_v25, %s1334_s30 }
 0x816   :  { %v608_v40 = vpop.permute.xlu0 %607 }
 0x817   :  { %v1533_v49 = vadd.f32 %v608_v40, %v600_v38 }
 0x819   :  { %1210 = vtanh.f32 %v1533_v49  ;;  %v695_v57 = vrot.slane %v1533_v49, 6 }
 0x81a   :  { %1212 = vpow2.f32 %v1090_v53 }
 0x81f   :  { %v1211_v44 = vpop.eup %1210 }
 0x820   :  { %613 = vrot.lane.b32.xlu1 %v1211_v44, %s1334_s30  ;;  %v1213_v52 = vpop.eup %1212 }
 0x821   :  { %v565_v8 = vadd.f32 1.0, %v1213_v52 }
 0x823   :  { %1214 = vrcp.f32 %v565_v8  ;;  %v592_v15 = vand.u32 2147483648, %v565_v8  ;;  %vm586_vm9 = vweird.f32 %v565_v8  ;;  %v590_v16 = vand.u32 2147483647, %v565_v8 }
 0x825   :  { %v593_v30 = vor.u32 1.1754944e-38, %v592_v15  ;;  %vm591_vm12 = vcmp.eq.f32.partialorder %v590_v16, 8.507059e+37 }
 0x829   :  { %v1215_v11 = vpop.eup %1214 }
 0x82a   :  { %v582_v12 = vmul.f32 %v1215_v11, %v565_v8  ;;  %vm587_vm8 = vweird.f32 %v1215_v11 }
 0x82b   :  { %vm588_vm11 = vmor %vm586_vm9, %vm587_vm8 }
 0x82c   :  { %v583_v13 = vsub.f32 1.0, %v582_v12 }
 0x82e   :  { %v584_v28 = vmul.f32 %v1215_v11, %v583_v13 }
 0x830   :  { %v585_v14 = vadd.f32 %v1215_v11, %v584_v28 }
 0x832   :  { %v589_v17 = vsel %vm588_vm11, %v1215_v11, %v585_v14 }
 0x833   :  { %v594_v18 = vsel %vm591_vm12, %v593_v30, %v589_v17 }
 0x892   :  { %v614_v19 = vpop.permute.xlu1 %613 }
 0x893   :  { %v616_v20 = vmul.f32 %v614_v19, %v594_v18 }
 0x895   :  { %v617_v21 = vpack.c.bf16 %v616_v20, %v616_v20 }
 0x897   :  { %1091 = vmatmul.msk.bf16.vlgmr.msra.gmra.mxu2 %vm227_vm10, %v617_v21  ;;  %1092 = vmatmul.msk.bf16.vlgmr.msra.gmra.mxu3 %vm227_vm10, %v617_v21 }
 0x91a   :  { %v630_v22 = vpop.f32.mrf.mxu2  ;;  %v643_v23 = vpop.f32.mrf.mxu3 }
 0x91b   :  { %v650_v24 = vrot.slane %v643_v23, 6  ;;  %v649_v33 = vrot.slane %v630_v22, 6 }
 0x91d   :  { %v654_v26 = vadd.f32 %v650_v24, %v1498_v9  ;;  %v653_v34 = vadd.f32 %v649_v33, %v1500_v10 }
 0x91f   :  { %1216 = vtanh.f32 %v654_v26  ;;  %v1093_v35 = vmul.f32 -1.442695, %v653_v34  ;;  %v1094_v61 = vmul.f32 -1.442695, %v654_v26 }
 0x921   :  { %1218 = vpow2.f32 %v1093_v35 }
 0x922   :  { %v632_v29 = vpop.f32.mrf.mxu2  ;;  %v645_v31 = vpop.f32.mrf.mxu3 }
 0x925   :  { %v1217_v32 = vpop.eup %1216 }
 0x926   :  { %699 = vrot.lane.b32.xlu2 %v1217_v32, %s1334_s30 }
 0x927   :  { %v1219_v36 = vpop.eup %1218 }
 0x928   :  { %v661_v37 = vadd.f32 1.0, %v1219_v36 }
 0x92a   :  { %1220 = vrcp.f32 %v661_v37  ;;  %v674_v46 = vand.u32 2147483648, %v661_v37  ;;  %vm668_vm14 = vweird.f32 %v661_v37  ;;  %v672_v47 = vand.u32 2147483647, %v661_v37 }
 0x92c   :  { %v675_v50 = vor.u32 1.1754944e-38, %v674_v46  ;;  %vm673_vm0 = vcmp.eq.f32.partialorder %v672_v47, 8.507059e+37 }
 0x930   :  { %v1221_v39 = vpop.eup %1220 }
 0x931   :  { %v664_v41 = vmul.f32 %v1221_v39, %v661_v37  ;;  %vm669_vm13 = vweird.f32 %v1221_v39 }
 0x932   :  { %vm670_vm15 = vmor %vm668_vm14, %vm669_vm13 }
 0x933   :  { %v665_v42 = vsub.f32 1.0, %v664_v41 }
 0x935   :  { %v666_v43 = vmul.f32 %v1221_v39, %v665_v42 }
 0x937   :  { %v667_v45 = vadd.f32 %v1221_v39, %v666_v43 }
 0x939   :  { %v671_v48 = vsel %vm670_vm15, %v1221_v39, %v667_v45 }
 0x93a   :  { %v676_v55 = vsel %vm673_vm0, %v675_v50, %v671_v48 }
 0x93b   :  { %v697_v58 = vmul.f32 %v695_v57, %v676_v55 }
 0x980   :  { %v700_v51 = vpop.permute.xlu2 %699 }
 0x981   :  { %v702_v56 = vmul.f32 %v700_v51, %v676_v55 }
 0x983   :  { %704 = vrot.lane.b32.xlu0 %v702_v56, %s1334_s30 }
 0x9f5   :  { %v705_v54 = vpop.permute.xlu0 %704 }
 0x9f6   :  { %v1544_v59 = vadd.f32 %v705_v54, %v697_v58 }
 0x9f8   :  { %1222 = vtanh.f32 %v1544_v59  ;;  %v794_v34 = vrot.slane %v1544_v59, 6 }
 0x9f9   :  { %1224 = vpow2.f32 %v1094_v61 }
 0x9fe   :  { %v1223_v60 = vpop.eup %1222 }
 0x9ff   :  { %710 = vrot.lane.b32.xlu1 %v1223_v60, %s1334_s30  ;;  %v1225_v62 = vpop.eup %1224 }
 0xa00   :  { %v662_v63 = vadd.f32 1.0, %v1225_v62 }
 0xa02   :  { %1226 = vrcp.f32 %v662_v63  ;;  %v689_v5 = vand.u32 2147483648, %v662_v63  ;;  %vm683_vm2 = vweird.f32 %v662_v63  ;;  %v687_v6 = vand.u32 2147483647, %v662_v63 }
 0xa04   :  { %v690_v25 = vor.u32 1.1754944e-38, %v689_v5  ;;  %vm688_vm4 = vcmp.eq.f32.partialorder %v687_v6, 8.507059e+37 }
 0xa08   :  { %v1227_v0 = vpop.eup %1226 }
 0xa09   :  { %v679_v1 = vmul.f32 %v1227_v0, %v662_v63  ;;  %vm684_vm1 = vweird.f32 %v1227_v0 }
 0xa0a   :  { %vm685_vm3 = vmor %vm683_vm2, %vm684_vm1 }
 0xa0b   :  { %v680_v2 = vsub.f32 1.0, %v679_v1 }
 0xa0d   :  { %v681_v3 = vmul.f32 %v1227_v0, %v680_v2 }
 0xa0f   :  { %v682_v4 = vadd.f32 %v1227_v0, %v681_v3 }
 0xa11   :  { %v686_v27 = vsel %vm685_vm3, %v1227_v0, %v682_v4 }
 0xa12   :  { %v691_v7 = vsel %vm688_vm4, %v690_v25, %v686_v27 }
 0xa71   :  { %v711_v38 = vpop.permute.xlu1 %710 }
 0xa72   :  { %v713_v40 = vmul.f32 %v711_v38, %v691_v7 }
 0xa74   :  { %v714_v49 = vpack.c.bf16 %v713_v40, %v713_v40 }
 0xa76   :  { %v716_v44 = vrot.slane %v714_v49, 1 }
 0xa78   :  { %1095 = vmatmul.msk.bf16.vlgmr.msrb.gmra.mxu0 %vm227_vm10, %v716_v44  ;;  %1096 = vmatmul.msk.bf16.vlgmr.msrb.gmra.mxu1 %vm227_vm10, %v716_v44 }
 0xaf5   :  { %v729_v53 = vpop.f32.mrf.mxu0  ;;  %v742_v52 = vpop.f32.mrf.mxu1 }
 0xaf6   :  { %v749_v8 = vrot.slane %v742_v52, 4  ;;  %v748_v14 = vrot.slane %v729_v53, 4 }
 0xaf8   :  { %v753_v11 = vadd.f32 %v749_v8, %v1498_v9  ;;  %v752_v15 = vadd.f32 %v748_v14, %v1500_v10  ;;  %v1144_v14 = vld [vmem:[%s1589_s3 + $0x10] sm:$0xff] }
 0xafa   :  { %1228 = vtanh.f32 %v753_v11  ;;  %v1097_v16 = vmul.f32 -1.442695, %v752_v15  ;;  %v1098_v41 = vmul.f32 -1.442695, %v753_v11  ;;  %v1143_v15 = vld [vmem:[%s1589_s3 + $0x8] sm:$0xff] }
 0xafc   :  { %1230 = vpow2.f32 %v1097_v16 }
 0xafd   :  { %v731_v12 = vpop.f32.mrf.mxu0  ;;  %v744_v13 = vpop.f32.mrf.mxu1 }
 0xb00   :  { %v1229_v28 = vpop.eup %1228 }
 0xb01   :  { %798 = vrot.lane.b32.xlu2 %v1229_v28, %s1334_s30  ;;  %v1145_v28 = vld [vmem:[%s1589_s3 + $0x18] sm:$0xff] }
 0xb02   :  { %v1231_v17 = vpop.eup %1230  ;;  %956 = vmatpush.bf16.msra.mxu0 %v1145_v28 }
 0xb03   :  { %v760_v30 = vadd.f32 1.0, %v1231_v17 }
 0xb05   :  { %1232 = vrcp.f32 %v760_v30  ;;  %v773_v23 = vand.u32 2147483648, %v760_v30  ;;  %vm767_vm6 = vweird.f32 %v760_v30  ;;  %v771_v24 = vand.u32 2147483647, %v760_v30 }
 0xb06   :  { %957 = vmatpush.bf16.msra.mxu0 %v1144_v14 }
 0xb07   :  { %v774_v29 = vor.u32 1.1754944e-38, %v773_v23  ;;  %vm772_vm8 = vcmp.eq.f32.partialorder %v771_v24, 8.507059e+37  ;;  %v1142_v23 = vld [vmem:[%s1589_s3] sm:$0xff]  ;;  %v1147_v24 = vld [vmem:[#allocation5 + $0x8] sm:$0xff] }
 0xb08   :  { %993 = vmatpush.bf16.msra.mxu1 %v1147_v24 }
 0xb0a   :  { %958 = vmatpush.bf16.msra.mxu0 %v1143_v15 }
 0xb0b   :  { %v1233_v18 = vpop.eup %1232 }
 0xb0c   :  { %v763_v19 = vmul.f32 %v1233_v18, %v760_v30  ;;  %vm768_vm5 = vweird.f32 %v1233_v18 }
 0xb0d   :  { %vm769_vm7 = vmor %vm767_vm6, %vm768_vm5  ;;  %vm983_vm6 = vcmask 261120  }
 0xb0e   :  { %v764_v20 = vsub.f32 1.0, %v763_v19  ;;  %959 = vmatpush.bf16.msra.mxu0 %v1142_v23 }
 0xb10   :  { %v765_v21 = vmul.f32 %v1233_v18, %v764_v20 }
 0xb12   :  { %v766_v22 = vadd.f32 %v1233_v18, %v765_v21 }
 0xb14   :  { %v770_v26 = vsel %vm769_vm7, %v1233_v18, %v766_v22 }
 0xb15   :  { %v775_v32 = vsel %vm772_vm8, %v774_v29, %v770_v26  ;;  %v1146_v26 = vld [vmem:[#allocation5] sm:$0xff] }
 0xb16   :  { %v796_v35 = vmul.f32 %v794_v34, %v775_v32  ;;  %994 = vmatpush.bf16.msra.mxu1 %v1146_v26 }
 0xb5b   :  { %v799_v31 = vpop.permute.xlu2 %798 }
 0xb5c   :  { %v801_v33 = vmul.f32 %v799_v31, %v775_v32 }
 0xb5e   :  { %803 = vrot.lane.b32.xlu0 %v801_v33, %s1334_s30 }
 0xbd0   :  { %v804_v36 = vpop.permute.xlu0 %803 }
 0xbd1   :  { %v1555_v37 = vadd.f32 %v804_v36, %v796_v35 }
 0xbd3   :  { %1234 = vtanh.f32 %v1555_v37  ;;  %v893_v16 = vrot.slane %v1555_v37, 6 }
 0xbd4   :  { %1236 = vpow2.f32 %v1098_v41 }
 0xbd9   :  { %v1235_v39 = vpop.eup %1234 }
 0xbda   :  { %809 = vrot.lane.b32.xlu1 %v1235_v39, %s1334_s30  ;;  %v1237_v42 = vpop.eup %1236 }
 0xbdb   :  { %v761_v43 = vadd.f32 1.0, %v1237_v42 }
 0xbdd   :  { %1238 = vrcp.f32 %v761_v43  ;;  %v788_v51 = vand.u32 2147483648, %v761_v43  ;;  %vm782_vm11 = vweird.f32 %v761_v43  ;;  %v786_v55 = vand.u32 2147483647, %v761_v43 }
 0xbdf   :  { %v789_v57 = vor.u32 1.1754944e-38, %v788_v51  ;;  %vm787_vm13 = vcmp.eq.f32.partialorder %v786_v55, 8.507059e+37 }
 0xbe3   :  { %v1239_v45 = vpop.eup %1238 }
 0xbe4   :  { %v778_v46 = vmul.f32 %v1239_v45, %v761_v43  ;;  %vm783_vm9 = vweird.f32 %v1239_v45 }
 0xbe5   :  { %vm784_vm12 = vmor %vm782_vm11, %vm783_vm9 }
 0xbe6   :  { %v779_v47 = vsub.f32 1.0, %v778_v46 }
 0xbe8   :  { %v780_v48 = vmul.f32 %v1239_v45, %v779_v47  ;;  %v920_v47 = vld [vmem:[%s1589_s3 + $0x20] sm:$0x1] }
 0xbea   :  { %v781_v50 = vadd.f32 %v1239_v45, %v780_v48  ;;  %v921_v48 = vunpack.c.l.bf16 %v920_v47 }
 0xbec   :  { %v785_v56 = vsel %vm784_vm12, %v1239_v45, %v781_v50 }
 0xbed   :  { %v790_v58 = vsel %vm787_vm13, %v789_v57, %v785_v56 }
 0xc4c   :  { %v810_v54 = vpop.permute.xlu1 %809 }
 0xc4d   :  { %v812_v59 = vmul.f32 %v810_v54, %v790_v58 }
 0xc4f   :  { %v813_v60 = vpack.c.bf16 %v812_v59, %v812_v59 }
 0xc51   :  { %v815_v61 = vrot.slane %v813_v60, 2 }
 0xc53   :  { %1099 = vmatmul.msk.bf16.vlgmr.msrb.gmra.mxu2 %vm227_vm10, %v815_v61  ;;  %1100 = vmatmul.msk.bf16.vlgmr.msrb.gmra.mxu3 %vm227_vm10, %v815_v61 }
 0xcd6   :  { %v828_v62 = vpop.f32.mrf.mxu2  ;;  %v841_v63 = vpop.f32.mrf.mxu3 }
 0xcd7   :  { %v848_v0 = vrot.slane %v841_v63, 2  ;;  %v847_v5 = vrot.slane %v828_v62, 2 }
 0xcd9   :  { %v852_v1 = vadd.f32 %v848_v0, %v1498_v9  ;;  %v851_v6 = vadd.f32 %v847_v5, %v1500_v10 }
 0xcdb   :  { %1240 = vtanh.f32 %v852_v1  ;;  %v1101_v27 = vmul.f32 -1.442695, %v851_v6  ;;  %v1102_v20 = vmul.f32 -1.442695, %v852_v1 }
 0xcdd   :  { %1242 = vpow2.f32 %v1101_v27 }
 0xcde   :  { %v830_v2 = vpop.f32.mrf.mxu2  ;;  %v843_v3 = vpop.f32.mrf.mxu3 }
 0xce1   :  { %v1241_v4 = vpop.eup %1240 }
 0xce2   :  { %897 = vrot.lane.b32.xlu2 %v1241_v4, %s1334_s30 }
 0xce3   :  { %v1243_v25 = vpop.eup %1242 }
 0xce4   :  { %v859_v7 = vadd.f32 1.0, %v1243_v25 }
 0xce6   :  { %1244 = vrcp.f32 %v859_v7  ;;  %v872_v9 = vand.u32 2147483648, %v859_v7  ;;  %vm866_vm15 = vweird.f32 %v859_v7  ;;  %v870_v52 = vand.u32 2147483647, %v859_v7 }
 0xce8   :  { %v873_v11 = vor.u32 1.1754944e-38, %v872_v9  ;;  %vm871_vm1 = vcmp.eq.f32.partialorder %v870_v52, 8.507059e+37 }
 0xcec   :  { %v1245_v38 = vpop.eup %1244 }
 0xced   :  { %v862_v40 = vmul.f32 %v1245_v38, %v859_v7  ;;  %vm867_vm14 = vweird.f32 %v1245_v38 }
 0xcee   :  { %vm868_vm0 = vmor %vm866_vm15, %vm867_vm14 }
 0xcef   :  { %v863_v49 = vsub.f32 1.0, %v862_v40 }
 0xcf1   :  { %v864_v44 = vmul.f32 %v1245_v38, %v863_v49 }
 0xcf3   :  { %v865_v53 = vadd.f32 %v1245_v38, %v864_v44 }
 0xcf5   :  { %v869_v8 = vsel %vm868_vm0, %v1245_v38, %v865_v53 }
 0xcf6   :  { %v874_v10 = vsel %vm871_vm1, %v873_v11, %v869_v8 }
 0xcf7   :  { %v895_v17 = vmul.f32 %v893_v16, %v874_v10 }
 0xd3c   :  { %v898_v12 = vpop.permute.xlu2 %897 }
 0xd3d   :  { %v900_v13 = vmul.f32 %v898_v12, %v874_v10 }
 0xd3f   :  { %902 = vrot.lane.b32.xlu0 %v900_v13, %s1334_s30 }
 0xdb1   :  { %v903_v30 = vpop.permute.xlu0 %902 }
 0xdb2   :  { %v905_v18 = vadd.f32 %v903_v30, %v895_v17 }
 0xdb4   :  { %1246 = vtanh.f32 %v905_v18 }
 0xdb5   :  { %1248 = vpow2.f32 %v1102_v20 }
 0xdba   :  { %v1247_v19 = vpop.eup %1246 }
 0xdbb   :  { %908 = vrot.lane.b32.xlu1 %v1247_v19, %s1334_s30  ;;  %v1249_v21 = vpop.eup %1248 }
 0xdbc   :  { %v860_v22 = vadd.f32 1.0, %v1249_v21 }
 0xdbe   :  { %1250 = vrcp.f32 %v860_v22  ;;  %v887_v35 = vand.u32 2147483648, %v860_v22  ;;  %vm881_vm3 = vweird.f32 %v860_v22  ;;  %v885_v36 = vand.u32 2147483647, %v860_v22 }
 0xdc0   :  { %v888_v39 = vor.u32 1.1754944e-38, %v887_v35  ;;  %vm886_vm5 = vcmp.eq.f32.partialorder %v885_v36, 8.507059e+37 }
 0xdc4   :  { %v1251_v29 = vpop.eup %1250 }
 0xdc5   :  { %v877_v31 = vmul.f32 %v1251_v29, %v860_v22  ;;  %vm882_vm2 = vweird.f32 %v1251_v29 }
 0xdc6   :  { %vm883_vm4 = vmor %vm881_vm3, %vm882_vm2 }
 0xdc7   :  { %v878_v32 = vsub.f32 1.0, %v877_v31 }
 0xdc9   :  { %v879_v33 = vmul.f32 %v1251_v29, %v878_v32 }
 0xdcb   :  { %v880_v34 = vadd.f32 %v1251_v29, %v879_v33 }
 0xdcd   :  { %v884_v37 = vsel %vm883_vm4, %v1251_v29, %v880_v34 }
 0xdce   :  { %v889_v41 = vsel %vm886_vm5, %v888_v39, %v884_v37 }
 0xe2d   :  { %v909_v42 = vpop.permute.xlu1 %908 }
 0xe2e   :  { %v911_v43 = vmul.f32 %v909_v42, %v889_v41 }
 0xe30   :  { %v922_v45 = vpack.c.bf16 %v911_v43, %v911_v43 }
 0xe32   :  { %v924_v46 = vrot.slane %v922_v45, 3 }
 0xe34   :  { %1119 = vmatmul.msk.bf16.vlgmr.msra.gmra.mxu0 %vm227_vm10, %v924_v46 }
 0xeb1   :  { %v961_v50 = vpop.f32.mrf.mxu0 }
 0xeb2   :  { %v962_v51 = vadd.f32 %v961_v50, %v921_v48 }
 0xeb4   :  { %v965_v55 = vmax.f32 %v962_v51, 0.0 }
 0xeb6   :  { %v966_v56 = vpack.c.bf16 %v965_v55, %v965_v55 }
 0xeb8   :  { %1128 = vmatmul.msk.bf16.vlgmr.msra.gmra.mxu1 %vm983_vm6, %v966_v56 }
 0xeb9   :  { %v963_v57 = vpop.f32.mrf.mxu0 }
 0xf35   :  { %v996_v58 = vpop.f32.mrf.mxu1 }
 0xf36   :  { %1000 = vst [vmem:[#allocation7] sm:$0x3] %v996_v58 }
 0xf37   :  { %1011 = dma.vmem_to_hbm [thread:$0]  %s1007_s4, 32, %s1009_s10, [#allocation4]  }
 0xf3d   :  { %v998_v54 = vpop.f32.mrf.mxu1 }
 0xf3e   :  { %1328 = dma.done.wait [#allocation4], 32  }
 0xf3f   :  { %1329 = vsyncadd [#allocation4], 4294967264 }
 0xf40   :  { %1016 = vsyncpa [#allocation3], 1 }
 0xf41   :  { %1017 = vsyncpa [#allocation6], 1 }
 0xf42   :  { %1018 = vsyncpa [#allocation4], 1 }

</bundles_post_ra>
